<compile_context>
chip_gen: v7x
topology: tpu7x:2x2x1
jax: 0.10.0
libtpu: 0.0.40
codegen_flags: <defaults>
</compile_context>

<pallas_src>
import functools

import jax
import jax.numpy as jnp
from jax.experimental import pallas as pl
from jax.experimental.pallas import tpu as pltpu


def _round_up(x: int, m: int) -> int:
    return ((x + m - 1) // m) * m


def _split(total: int, max_tile: int, align: int):
    """Balanced tiling: (tile, padded_total) with tile % align == 0,
    tile ~<= max_tile, padded_total % tile == 0, minimal padding."""
    total_a = _round_up(total, align)
    if total_a <= max_tile:
        return total_a, total_a
    n = -(-total_a // max_tile)                  # ceil
    tile = _round_up(-(-total_a // n), align)    # ceil(total_a / n), aligned
    return tile, n * tile


def _patch_embed_kernel(x_ref, w_ref, b_ref, o_ref):
    # Single-K-tile path: (TM, K) @ (K, TE) on the MXU, f32 accumulation,
    # + f32 bias, cast to output dtype on the lane-dense store.
    acc = jnp.dot(x_ref[...], w_ref[...], preferred_element_type=jnp.float32)
    o_ref[...] = (acc + b_ref[...]).astype(o_ref.dtype)


def _patch_embed_kernel_acc(x_ref, w_ref, b_ref, o_ref, acc_ref):
    # K-tiled path: f32 accumulator in VMEM scratch; bias + store on last step.
    k = pl.program_id(2)

    @pl.when(k == 0)
    def _():
        acc_ref[...] = jnp.zeros_like(acc_ref)

    acc_ref[...] += jnp.dot(x_ref[...], w_ref[...],
                            preferred_element_type=jnp.float32)

    @pl.when(k == pl.num_programs(2) - 1)
    def _():
        o_ref[...] = (acc_ref[...] + b_ref[...]).astype(o_ref.dtype)


@functools.partial(
    jax.jit,
    static_argnames=("img_size", "patch_size", "compute_dtype", "tm", "te", "tk"),
)
def patch_embed_forward(
    x,
    weight,
    bias,
    img_size,
    patch_size,
    *,
    compute_dtype=None,   # e.g. jnp.bfloat16 for ~2-4x MXU throughput
    tm=512,               # target rows per M tile
    te=1024,              # target cols per E tile (multiple of 128)
    tk=2048,              # target K tile; K-tiled path only if K exceeds this
):
    """Forward pass matching PyTorch PatchEmbed.

    x      : (B, C, H, W)   -- NCHW, same as PyTorch
    weight : (E, C, ph, pw) -- nn.Conv2d weight layout
    bias   : (E,)           -- nn.Conv2d bias
    returns: (B, num_patches, E)
    """
    B, C, H, W = x.shape
    assert H == img_size[0] and W == img_size[1], (
        f"Input image size ({H}*{W}) doesn't match model "
        f"({img_size[0]}*{img_size[1]})."
    )
    ph, pw = patch_size
    Hp, Wp = H // ph, W // pw
    num_patches = Hp * Wp
    E = weight.shape[0]
    K = C * ph * pw
    M = B * num_patches

    out_dtype = jnp.dtype(x.dtype)
    cdtype = jnp.dtype(compute_dtype) if compute_dtype is not None else out_dtype
    csize = cdtype.itemsize
    osize = out_dtype.itemsize
    sub = 16 if csize == 2 else 8

    # --- glue: extract non-overlapping patches (== conv with stride=kernel) ---
    # Cast first so XLA fuses the dtype conversion into the transpose pass.
    # (B, C, H, W) -> (B, C, Hp, ph, Wp, pw) -> (B, Hp, Wp, C, ph, pw) -> (M, K)
    patches = (
        x.astype(cdtype)
        .reshape(B, C, Hp, ph, Wp, pw)
        .transpose(0, 2, 4, 1, 3, 5)
        .reshape(M, K)
    )
    # Conv weight (E, C, ph, pw) -> (K, E) so that patches @ w_mat == conv out.
    w_mat = weight.reshape(E, K).T.astype(cdtype)
    b_mat = bias.astype(jnp.float32).reshape(1, E)

    # --- tiling: lane-dense last dims (x128), sublane-aligned M, minimal pad ---
    TE, E_pad = _split(E, _round_up(te, 128), 128)
    TK, K_pad = _split(K, _round_up(tk, 128), 128)
    TM, M_pad = _split(M, _round_up(tm, sub), sub)
    multi_k = (K_pad // TK) > 1

    # Keep the double-buffered pipeline footprint under a conservative budget
    # that is safe for the default scoped-VMEM limit on all of v5e/v6e/v7x.
    budget = 10 * 1024 * 1024

    def _vmem(tm_):
        per = (tm_ * TK * csize + TK * TE * csize + 8 * TE * 4
               + tm_ * TE * osize)
        return 2 * per + (tm_ * TE * 4 if multi_k else 0)

    while _vmem(TM) > budget and TM > sub:
        TM = max(sub, _round_up(TM // 2, sub))
    M_pad = _round_up(M, TM)

    # --- zero padding (contributes nothing to the dot; sliced off at the end) ---
    if (M_pad, K_pad) != (M, K):
        patches = jnp.pad(patches, ((0, M_pad - M), (0, K_pad - K)))
    if (K_pad, E_pad) != (K, E):
        w_mat = jnp.pad(w_mat, ((0, K_pad - K), (0, E_pad - E)))
    if E_pad != E:
        b_mat = jnp.pad(b_mat, ((0, 0), (0, E_pad - E)))

    cost = pl.CostEstimate(
        flops=2 * M_pad * K_pad * E_pad,
        transcendentals=0,
        bytes_accessed=(M_pad * K_pad * csize + K_pad * E_pad * csize
                        + E_pad * 4 + M_pad * E_pad * osize),
    )

    if not multi_k:
        grid = (M_pad // TM, E_pad // TE)
        out = pl.pallas_call(
            _patch_embed_kernel,
            out_shape=jax.ShapeDtypeStruct((M_pad, E_pad), out_dtype),
            grid_spec=pltpu.PrefetchScalarGridSpec(
                num_scalar_prefetch=0,
                grid=grid,
                in_specs=[
                    # Patch tile: changes with i, resident across the E axis.
                    pl.BlockSpec((TM, K_pad), lambda i, j: (i, 0)),
                    # Weight tile: independent of the M axis.
                    pl.BlockSpec((K_pad, TE), lambda i, j: (0, j)),
                    # Bias tile (f32).
                    pl.BlockSpec((1, TE), lambda i, j: (0, j)),
                ],
                out_specs=pl.BlockSpec((TM, TE), lambda i, j: (i, j)),
            ),
            compiler_params=pltpu.CompilerParams(
                dimension_semantics=("parallel", "parallel"),
            ),
            cost_estimate=cost,
        )(patches, w_mat, b_mat)
    else:
        grid = (M_pad // TM, E_pad // TE, K_pad // TK)
        out = pl.pallas_call(
            _patch_embed_kernel_acc,
            out_shape=jax.ShapeDtypeStruct((M_pad, E_pad), out_dtype),
            grid_spec=pltpu.PrefetchScalarGridSpec(
                num_scalar_prefetch=0,
                grid=grid,
                in_specs=[
                    pl.BlockSpec((TM, TK), lambda i, j, k: (i, k)),
                    pl.BlockSpec((TK, TE), lambda i, j, k: (k, j)),
                    pl.BlockSpec((1, TE), lambda i, j, k: (0, j)),
                ],
                out_specs=pl.BlockSpec((TM, TE), lambda i, j, k: (i, j)),
                scratch_shapes=[pltpu.VMEM((TM, TE), jnp.float32)],
            ),
            compiler_params=pltpu.CompilerParams(
                # Reduction axis (K) last and "arbitrary"; others independent.
                dimension_semantics=("parallel", "parallel", "arbitrary"),
            ),
            cost_estimate=cost,
        )(patches, w_mat, b_mat)

    # Strip padding, then (B*num_patches, E) -> (B, num_patches, E)
    # == proj(x).flatten(2).transpose(1, 2)
    return out[:M, :E].reshape(B, num_patches, E)


def _reference(x, weight, bias, patch_size):
    B, C, H, W = x.shape
    ph, pw = patch_size
    Hp, Wp = H // ph, W // pw
    E = weight.shape[0]
    ref_patches = (
        x.reshape(B, C, Hp, ph, Wp, pw)
        .transpose(0, 2, 4, 1, 3, 5)
        .reshape(B, Hp * Wp, -1)
    )
    return jnp.einsum("bnk,ek->bne", ref_patches, weight.reshape(E, -1)) + bias


if __name__ == "__main__":
    # Small, module-consistent shapes; K (=192) and E (=96) exercise the
    # 128-alignment padding + lane-dense output path.
    img_size = (32, 16)
    patch_size = (8, 8)
    in_chans = 3
    embed_dim = 96
    B = 2

    key = jax.random.PRNGKey(0)
    kx, kw, kb = jax.random.split(key, 3)

    x = jax.random.normal(kx, (B, in_chans, img_size[0], img_size[1]), jnp.float32)
    weight = (
        jax.random.normal(
            kw, (embed_dim, in_chans, patch_size[0], patch_size[1]), jnp.float32
        )
        * 0.02
    )
    bias = jax.random.normal(kb, (embed_dim,), jnp.float32) * 0.02

    Hp, Wp = img_size[0] // patch_size[0], img_size[1] // patch_size[1]
    ref = _reference(x, weight, bias, patch_size)

    # f32, single-K-tile fast path (exact semantics of the PyTorch module).
    out_f32 = jax.block_until_ready(
        patch_embed_forward(x, weight, bias, img_size, patch_size)
    )
    assert out_f32.shape == (B, Hp * Wp, embed_dim)
    assert jnp.allclose(out_f32, ref, atol=1e-4, rtol=1e-4)

    # f32, forced K-tiled accumulator path (tk=128 -> 2 reduction steps).
    out_ksplit = jax.block_until_ready(
        patch_embed_forward(x, weight, bias, img_size, patch_size, tk=128)
    )
    assert out_ksplit.shape == (B, Hp * Wp, embed_dim)
    assert jnp.allclose(out_ksplit, ref, atol=1e-4, rtol=1e-4)

    # bf16 compute path (perf option): bf16 operands, f32 MXU accumulation.
    out_bf16 = jax.block_until_ready(
        patch_embed_forward(
            x, weight, bias, img_size, patch_size, compute_dtype=jnp.bfloat16
        )
    )
    assert out_bf16.shape == (B, Hp * Wp, embed_dim)
    assert jnp.allclose(out_bf16, ref, atol=2e-2, rtol=2e-2)

    print("KERNEL_OK")
</pallas_src>

<mosaic_0001>
module attributes {stable_mosaic.version = 11 : i64} {
  func.func @_patch_embed_kernel(%arg0: i32, %arg1: i32, %arg2: memref<16x256xf32, #tpu.memory_space<vmem>>, %arg3: memref<256x128xf32, #tpu.memory_space<vmem>>, %arg4: memref<1x128xf32, #tpu.memory_space<vmem>>, %arg5: memref<16x128xf32, #tpu.memory_space<vmem>>) attributes {dimension_semantics = [#tpu.dimension_semantics<parallel>, #tpu.dimension_semantics<parallel>], iteration_bounds = array<i64: 1, 1>, scalar_prefetch = 0 : i64, scratch_operands = 0 : i64, tpu.core_type = #tpu.core_type<tc>, window_params = [{transform_indices = @transform_0, window_bounds = array<i64: 16, 256>}, {transform_indices = @transform_1, window_bounds = array<i64: 256, 128>}, {transform_indices = @transform_2, window_bounds = array<i64: 1, 128>}, {transform_indices = @transform_3, window_bounds = array<i64: 16, 128>}]} {
    %c0 = arith.constant 0 : index
    %c0_0 = arith.constant 0 : index
    %0 = vector.load %arg2[%c0, %c0_0] : memref<16x256xf32, #tpu.memory_space<vmem>>, vector<16x256xf32>
    %c0_1 = arith.constant 0 : index
    %c0_2 = arith.constant 0 : index
    %1 = vector.load %arg3[%c0_1, %c0_2] : memref<256x128xf32, #tpu.memory_space<vmem>>, vector<256x128xf32>
    %cst = arith.constant dense<0.000000e+00> : vector<16x128xf32>
    %2 = tpu.matmul %0, %1, %cst {dimension_numbers = #tpu.dot_dimension_numbers<[1], [0], [0], [1], [0, 0, 1, 1], [], []>} : vector<16x256xf32>, vector<256x128xf32>, vector<16x128xf32> -> vector<16x128xf32>
    %c0_3 = arith.constant 0 : index
    %c0_4 = arith.constant 0 : index
    %3 = vector.load %arg4[%c0_3, %c0_4] : memref<1x128xf32, #tpu.memory_space<vmem>>, vector<1x128xf32>
    %4 = vector.broadcast %3 : vector<1x128xf32> to vector<16x128xf32>
    %5 = arith.addf %2, %4 : vector<16x128xf32>
    %c0_5 = arith.constant 0 : index
    %c0_6 = arith.constant 0 : index
    %6 = vector.load %arg5[%c0_5, %c0_6] : memref<16x128xf32, #tpu.memory_space<vmem>>, vector<16x128xf32>
    tpu.vector_store %arg5[%c0_5, %c0_6], %5 {strides = array<i32>} : memref<16x128xf32, #tpu.memory_space<vmem>>, vector<16x128xf32>,
    return
  }
  func.func @transform_0(%arg0: i32, %arg1: i32) -> (i32, i32) {
    %c0_i32 = arith.constant 0 : i32
    %c0_i32_0 = arith.constant 0 : i32
    return %arg0, %c0_i32 : i32, i32
  }
  func.func @transform_1(%arg0: i32, %arg1: i32) -> (i32, i32) {
    %c0_i32 = arith.constant 0 : i32
    %c0_i32_0 = arith.constant 0 : i32
    return %c0_i32, %arg1 : i32, i32
  }
  func.func @transform_2(%arg0: i32, %arg1: i32) -> (i32, i32) {
    %c0_i32 = arith.constant 0 : i32
    %c0_i32_0 = arith.constant 0 : i32
    return %c0_i32, %arg1 : i32, i32
  }
  func.func @transform_3(%arg0: i32, %arg1: i32) -> (i32, i32) {
    %c0_i32 = arith.constant 0 : i32
    return %arg0, %arg1 : i32, i32
  }
}

</mosaic_0001>

<bundles_post_ra>
// kernel: patch_embed_forward.1
= control target key start
LH: loop header
LB: loop body
LE: loop exit
PB: predicated region body
PF: predicated region fallthrough
CT: control target
= control target key end

     0   :  { %s362_s1 = inlined_call_operand.vmem [shape: f32[256,128], index: 1, kind: input, shape index: {}]   ;;  %s363_s0 = inlined_call_operand.vmem [shape: f32[16,256], index: 0, kind: input, shape index: {}]   ;;  %s364_s2 = inlined_call_operand.vmem [shape: f32[1,128], index: 2, kind: input, shape index: {}]   ;;  %s365_s3 = inlined_call_operand.vmem [shape: f32[16,128], index: 3, kind: output, shape index: {}]  }
   0x1   :  { %v34_v0 = vld [vmem:[%s362_s1 + $0x80] sm:$0xff]  ;;  %v35_v1 = vld [vmem:[%s362_s1 + $0x88] sm:$0xff]  ;;  %v36_v5 = vld [vmem:[%s362_s1 + $0x90] sm:$0xff] }
   0x2   :  { %v18_v2 = vld [vmem:[%s362_s1] sm:$0xff]  ;;  %v177_v3 = vpack.c.bf16 %v35_v1, %v34_v0  ;;  %v19_v4 = vld [vmem:[%s362_s1 + $0x8] sm:$0xff]  ;;  %v37_v6 = vld [vmem:[%s362_s1 + $0x98] sm:$0xff] }
   0x3   :  { %v179_v7 = vpack.c.bf16 %v19_v4, %v18_v2  ;;  %v181_v8 = vpack.c.bf16 %v37_v6, %v36_v5  ;;  %v20_v9 = vld [vmem:[%s362_s1 + $0x10] sm:$0xff]  ;;  %v21_v10 = vld [vmem:[%s362_s1 + $0x18] sm:$0xff]  ;;  %v38_v11 = vld [vmem:[%s362_s1 + $0xa0] sm:$0xff] }
   0x4   :  { %178 = vmatprep.subr.bf16.mxu0 %v177_v3  ;;  %209 = vmatprep.subr.bf16.mxu1 %v177_v3  ;;  %v39_v12 = vld [vmem:[%s362_s1 + $0xa8] sm:$0xff]  ;;  %v183_v13 = vpack.c.bf16 %v21_v10, %v20_v9  ;;  %v22_v15 = vld [vmem:[%s362_s1 + $0x20] sm:$0xff]  ;;  %v40_v17 = vld [vmem:[%s362_s1 + $0xb0] sm:$0xff] }
   0x5   :  { %180 = vmatpush3.bf16.msra.mxu0 %v179_v7  ;;  %217 = vmatpush3.bf16.msra.mxu1 %v179_v7  ;;  %v185_v14 = vpack.c.bf16 %v39_v12, %v38_v11  ;;  %v23_v16 = vld [vmem:[%s362_s1 + $0x28] sm:$0xff]  ;;  %v41_v18 = vld [vmem:[%s362_s1 + $0xb8] sm:$0xff]  ;;  %v24_v21 = vld [vmem:[%s362_s1 + $0x30] sm:$0xff] }
   0x6   :  { %182 = vmatprep.subr.bf16.mxu0 %v181_v8  ;;  %210 = vmatprep.subr.bf16.mxu1 %v181_v8  ;;  %v187_v19 = vpack.c.bf16 %v23_v16, %v22_v15  ;;  %v189_v20 = vpack.c.bf16 %v41_v18, %v40_v17  ;;  %v25_v22 = vld [vmem:[%s362_s1 + $0x38] sm:$0xff]  ;;  %v42_v23 = vld [vmem:[%s362_s1 + $0xc0] sm:$0xff]  ;;  %v43_v24 = vld [vmem:[%s362_s1 + $0xc8] sm:$0xff] }
   0x7   :  { %v15_v25 = vld [vmem:[%s363_s0 + $0x8] sm:$0xff]  ;;  %v17_v26 = vld [vmem:[%s363_s0 + $0x18] sm:$0xff]  ;;  %v191_v27 = vpack.c.bf16 %v25_v22, %v24_v21  ;;  %v193_v28 = vpack.c.bf16 %v43_v24, %v42_v23  ;;  %v26_v29 = vld [vmem:[%s362_s1 + $0x40] sm:$0xff] }
   0x8   :  { %121 = vmatprep.mubr.f32.mxu0 %v15_v25  ;;  %v27_v30 = vld [vmem:[%s362_s1 + $0x48] sm:$0xff]  ;;  %v44_v31 = vld [vmem:[%s362_s1 + $0xd0] sm:$0xff]  ;;  %v45_v32 = vld [vmem:[%s362_s1 + $0xd8] sm:$0xff]  ;;  %126 = vmatprep.mubr.f32.mxu1 %v17_v26 }
   0x9   :  { %184 = vmatpush3.bf16.msra.mxu0 %v183_v13  ;;  %218 = vmatpush3.bf16.msra.mxu1 %v183_v13  ;;  %v195_v33 = vpack.c.bf16 %v27_v30, %v26_v29  ;;  %v197_v34 = vpack.c.bf16 %v45_v32, %v44_v31  ;;  %v28_v35 = vld [vmem:[%s362_s1 + $0x50] sm:$0xff]  ;;  %v29_v36 = vld [vmem:[%s362_s1 + $0x58] sm:$0xff]  ;;  %v46_v37 = vld [vmem:[%s362_s1 + $0xe0] sm:$0xff] }
   0xa   :  { %186 = vmatprep.subr.bf16.mxu0 %v185_v14  ;;  %211 = vmatprep.subr.bf16.mxu1 %v185_v14  ;;  %v47_v38 = vld [vmem:[%s362_s1 + $0xe8] sm:$0xff]  ;;  %v199_v39 = vpack.c.bf16 %v29_v36, %v28_v35  ;;  %v30_v41 = vld [vmem:[%s362_s1 + $0x60] sm:$0xff]  ;;  %v48_v43 = vld [vmem:[%s362_s1 + $0xf0] sm:$0xff] }
   0xb   :  { %v201_v40 = vpack.c.bf16 %v47_v38, %v46_v37  ;;  %v31_v42 = vld [vmem:[%s362_s1 + $0x68] sm:$0xff]  ;;  %v49_v44 = vld [vmem:[%s362_s1 + $0xf8] sm:$0xff]  ;;  %v32_v47 = vld [vmem:[%s362_s1 + $0x70] sm:$0xff] }
   0xc   :  { %v203_v45 = vpack.c.bf16 %v31_v42, %v30_v41  ;;  %v205_v46 = vpack.c.bf16 %v49_v44, %v48_v43  ;;  %v33_v48 = vld [vmem:[%s362_s1 + $0x78] sm:$0xff]  ;;  %v14_v50 = vld [vmem:[%s363_s0] sm:$0xff]  ;;  %v16_v51 = vld [vmem:[%s363_s0 + $0x10] sm:$0xff] }
   0xd   :  { %188 = vmatpush3.bf16.msra.mxu0 %v187_v19  ;;  %219 = vmatpush3.bf16.msra.mxu1 %v187_v19  ;;  %v207_v49 = vpack.c.bf16 %v33_v48, %v32_v47  ;;  %v138_v54 = vld [vmem:[%s364_s2] ss:$0 sm:$0xff] }
   0xe   :  { %190 = vmatprep.subr.bf16.mxu0 %v189_v20  ;;  %212 = vmatprep.subr.bf16.mxu1 %v189_v20 }
  0x11   :  { %192 = vmatpush3.bf16.msra.mxu0 %v191_v27  ;;  %220 = vmatpush3.bf16.msra.mxu1 %v191_v27 }
  0x12   :  { %194 = vmatprep.subr.bf16.mxu0 %v193_v28  ;;  %213 = vmatprep.subr.bf16.mxu1 %v193_v28 }
  0x15   :  { %196 = vmatpush3.bf16.msra.mxu0 %v195_v33  ;;  %221 = vmatpush3.bf16.msra.mxu1 %v195_v33 }
  0x16   :  { %198 = vmatprep.subr.bf16.mxu0 %v197_v34  ;;  %214 = vmatprep.subr.bf16.mxu1 %v197_v34 }
  0x19   :  { %200 = vmatpush3.bf16.msra.mxu0 %v199_v39  ;;  %222 = vmatpush3.bf16.msra.mxu1 %v199_v39 }
  0x1a   :  { %202 = vmatprep.subr.bf16.mxu0 %v201_v40  ;;  %215 = vmatprep.subr.bf16.mxu1 %v201_v40 }
  0x1d   :  { %204 = vmatpush3.bf16.msra.mxu0 %v203_v45  ;;  %223 = vmatpush3.bf16.msra.mxu1 %v203_v45 }
  0x1e   :  { %206 = vmatprep.subr.bf16.mxu0 %v205_v46  ;;  %216 = vmatprep.subr.bf16.mxu1 %v205_v46 }
  0x21   :  { %208 = vmatpush3.bf16.msra.mxu0 %v207_v49  ;;  %224 = vmatpush3.bf16.msra.mxu1 %v207_v49 }
  0x24   :  { %122 = vmatmul.mubr.f32.vlgmr.msra.gmra.mrb[0].mxu0 %v14_v50  ;;  %127 = vmatmul.mubr.f32.vlgmr.msra.gmra.mrb[0].mxu1 %v16_v51 }
  0xf7   :  { %v171_v52 = vpop.f32.mrb[0].mxu0  ;;  %v174_v53 = vpop.f32.mrb[0].mxu1 }
  0xf8   :  { %v172_v55 = vpop.f32.mrb[1].mxu0  ;;  %v175_v56 = vpop.f32.mrb[1].mxu1 }
  0xf9   :  { %v173_v57 = vadd.f32 %v172_v55, %v171_v52  ;;  %v176_v58 = vadd.f32 %v175_v56, %v174_v53 }
  0xfb   :  { %v124_v59 = vadd.f32 %v173_v57, %v138_v54  ;;  %v129_v60 = vadd.f32 %v176_v58, %v138_v54 }
  0xfd   :  { %132 = vst [vmem:[%s365_s3] sm:$0xff] %v124_v59  ;;  %133 = vst [vmem:[%s365_s3 + $0x8] sm:$0xff] %v129_v60 }

</bundles_post_ra>
